<compile_context>
chip_gen: v7x
topology: tpu7x:2x2x1
jax: 0.10.0
libtpu: 0.0.40
codegen_flags: <defaults>
</compile_context>

<pallas_src>
import functools

import jax
import jax.numpy as jnp
from jax.experimental import pallas as pl
from jax.experimental.pallas import tpu as pltpu

LANE = 128
SUBLANE = 8


def _round_up(x, m):
    return ((x + m - 1) // m) * m


def _cdiv(a, b):
    return (a + b - 1) // b


def policy_mlp_kernel(x_ref, w1_ref, b1_ref, w2_ref, b2_ref, w3_ref, b3_ref,
                      o_ref):
    # All three matmuls + activations fused in one kernel invocation.
    # NOTE: rows (batch) are fully independent.  The last batch block may be
    # partial; its out-of-range rows hold unspecified data and their output
    # rows are masked on writeback.  Do NOT add any cross-row reduction here.
    x = x_ref[...]
    if x.dtype != jnp.bfloat16:           # no-op if the caller passes bf16
        x = x.astype(jnp.bfloat16)
    h1 = jnp.dot(x, w1_ref[...], preferred_element_type=jnp.float32)
    h1 = jnp.maximum(h1 + b1_ref[...], 0.0)                      # ReLU
    h2 = jnp.dot(h1.astype(jnp.bfloat16), w2_ref[...],
                 preferred_element_type=jnp.float32)
    h2 = jnp.maximum(h2 + b2_ref[...], 0.0)                      # ReLU
    z = jnp.dot(h2.astype(jnp.bfloat16), w3_ref[...],
                preferred_element_type=jnp.float32)
    z = z + b3_ref[...]
    o_ref[...] = jax.nn.sigmoid(z).astype(o_ref.dtype)           # Sigmoid, bf16


def prepare_kernel_params(params_f32):
    """fp32 (in,out) params -> kernel params.

    Weights cast to bf16, biases kept fp32, final layer padded to a multiple
    of 128 output lanes so the kernel's output store is lane-dense.  The
    padded columns produce sigmoid(0)=0.5 and are stripped by the wrapper.
    Returns (kernel_params, action_dim).
    """
    w1, b1, w2, b2, w3, b3 = params_f32
    action_dim = w3.shape[1]
    out_pad = _round_up(action_dim, LANE)
    w3p = jnp.zeros((w3.shape[0], out_pad), jnp.float32).at[:, :action_dim].set(w3)
    b3p = jnp.zeros((1, out_pad), jnp.float32).at[:, :action_dim].set(b3)
    kernel_params = (
        w1.astype(jnp.bfloat16), b1.astype(jnp.float32),
        w2.astype(jnp.bfloat16), b2.astype(jnp.float32),
        w3p.astype(jnp.bfloat16), b3p.astype(jnp.float32),
    )
    return kernel_params, action_dim


@functools.partial(jax.jit, static_argnames=("action_dim", "max_tile_b"))
def policy_network_forward(state, kernel_params, action_dim, *, max_tile_b=1024):
    """state: [B, state_dim] (fp32 or bf16) -> [B, action_dim] bf16.

    NOTE: matmul operands and the returned activations are bf16 (~1e-2
    relative accuracy vs an fp32 reference) - fine for a sigmoid policy head.
    """
    assert max_tile_b % SUBLANE == 0
    w1, b1, w2, b2, w3, b3 = kernel_params
    B, state_dim = state.shape
    hidden1 = w1.shape[1]
    hidden2 = w2.shape[1]
    out_pad = w3.shape[1]          # already a multiple of 128 (lane-dense)

    # Batch tiling: as few, as big steps as possible (per-step pipeline
    # overhead ~0.35us dominates MXU time here).  When more than one step is
    # needed, use an even step count with balanced tiles so v7x's two
    # TensorCores split the batch evenly; this costs at most one extra small
    # step on single-TC v5e/v6e.
    n_steps = _cdiv(B, max_tile_b)
    if n_steps > 1 and n_steps % 2:
        n_steps += 1
    tb = _round_up(_cdiv(B, n_steps), SUBLANE)
    grid = (_cdiv(B, tb),)

    # Batch is tiled over the grid; weights/biases use constant index maps so
    # Pallas keeps them resident (no re-DMA) across grid steps.
    in_specs = [
        pl.BlockSpec((tb, state_dim), lambda i: (i, 0)),     # state tile
        pl.BlockSpec(w1.shape, lambda i: (0, 0)),            # W1 (bf16)
        pl.BlockSpec(b1.shape, lambda i: (0, 0)),            # b1 (fp32)
        pl.BlockSpec(w2.shape, lambda i: (0, 0)),            # W2 (bf16)
        pl.BlockSpec(b2.shape, lambda i: (0, 0)),            # b2 (fp32)
        pl.BlockSpec(w3.shape, lambda i: (0, 0)),            # W3 padded (bf16)
        pl.BlockSpec(b3.shape, lambda i: (0, 0)),            # b3 padded (fp32)
    ]
    out_spec = pl.BlockSpec((tb, out_pad), lambda i: (i, 0))  # lane-dense out

    weight_elems = state_dim * hidden1 + hidden1 * hidden2 + hidden2 * out_pad
    in_bytes = state.dtype.itemsize
    cost = pl.CostEstimate(
        flops=2 * B * weight_elems,
        transcendentals=B * out_pad,                          # sigmoid
        bytes_accessed=(B * state_dim * in_bytes              # input
                        + B * out_pad * 2                     # bf16 output
                        + 2 * weight_elems                    # bf16 weights
                        + 4 * (hidden1 + hidden2 + out_pad)), # fp32 biases
    )

    out = pl.pallas_call(
        policy_mlp_kernel,
        out_shape=jax.ShapeDtypeStruct((B, out_pad), jnp.bfloat16),
        grid_spec=pltpu.PrefetchScalarGridSpec(
            num_scalar_prefetch=0,
            grid=grid,
            in_specs=in_specs,
            out_specs=out_spec,
        ),
        compiler_params=pltpu.CompilerParams(
            dimension_semantics=("parallel",),      # megacore split on v7x only
            vmem_limit_bytes=32 * 1024 * 1024),     # headroom above v5e's 16 MiB default
        cost_estimate=cost,
    )(state, w1, b1, w2, b2, w3, b3)

    # Strip the padded output lanes (>= action_dim hold sigmoid(0)=0.5).
    return out[:, :action_dim]


def init_params(key, state_dim, action_dim):
    """Deterministic synthetic init (uniform, Kaiming-style bounds), fp32."""
    k1, k2, k3, k4, k5, k6 = jax.random.split(key, 6)

    def lin(kw, kb, fan_in, fan_out):
        bound = 1.0 / jnp.sqrt(fan_in)
        w = jax.random.uniform(kw, (fan_in, fan_out), jnp.float32,
                               -bound, bound)
        b = jax.random.uniform(kb, (1, fan_out), jnp.float32, -bound, bound)
        return w, b

    w1, b1 = lin(k1, k2, state_dim, 256)
    w2, b2 = lin(k3, k4, 256, 128)
    w3, b3 = lin(k5, k6, 128, action_dim)
    return (w1, b1, w2, b2, w3, b3)


def policy_network_ref(state, params):
    w1, b1, w2, b2, w3, b3 = params
    h1 = jnp.maximum(state @ w1 + b1, 0.0)
    h2 = jnp.maximum(h1 @ w2 + b2, 0.0)
    return jax.nn.sigmoid(h2 @ w3 + b3)


if __name__ == "__main__":
    key = jax.random.PRNGKey(0)
    k_param, k_state, k_state2 = jax.random.split(key, 3)

    state_dim = 32
    action_dim = 8

    params_f32 = init_params(k_param, state_dim, action_dim)
    kernel_params, adim = prepare_kernel_params(params_f32)

    # Small batch: whole batch runs as one lane-dense block (grid=(1,)).
    batch = 8
    state = jax.random.normal(k_state, (batch, state_dim), jnp.float32)
    out = policy_network_forward(state, kernel_params, adim)
    out = jax.block_until_ready(out)
    ref = policy_network_ref(state, params_f32)
    assert out.shape == (batch, action_dim)
    # bf16 matmul operands + bf16 output vs fp32 reference -> relaxed tolerance.
    err = jnp.max(jnp.abs(out.astype(jnp.float32) - ref))
    assert err < 2e-2, float(err)

    # Larger batch: no host-side pad, grid=(2,) with balanced 520-row tiles
    # (even split across v7x's two TensorCores; 2 steps instead of 3 on all
    # generations).
    batch2 = 1040
    state2 = jax.random.normal(k_state2, (batch2, state_dim), jnp.float32)
    out2 = policy_network_forward(state2, kernel_params, adim, max_tile_b=1024)
    out2 = jax.block_until_ready(out2)
    ref2 = policy_network_ref(state2, params_f32)
    assert out2.shape == (batch2, action_dim)
    err2 = jnp.max(jnp.abs(out2.astype(jnp.float32) - ref2))
    assert err2 < 2e-2, float(err2)

    print("KERNEL_OK")
</pallas_src>

<mosaic_0001>
module attributes {stable_mosaic.version = 11 : i64} {
  func.func @policy_mlp_kernel(%arg0: i32, %arg1: memref<8x32xf32, #tpu.memory_space<vmem>>, %arg2: memref<32x256xbf16, #tpu.memory_space<vmem>>, %arg3: memref<1x256xf32, #tpu.memory_space<vmem>>, %arg4: memref<256x128xbf16, #tpu.memory_space<vmem>>, %arg5: memref<1x128xf32, #tpu.memory_space<vmem>>, %arg6: memref<128x128xbf16, #tpu.memory_space<vmem>>, %arg7: memref<1x128xf32, #tpu.memory_space<vmem>>, %arg8: memref<8x128xbf16, #tpu.memory_space<vmem>>) attributes {dimension_semantics = [#tpu.dimension_semantics<parallel>], iteration_bounds = array<i64: 1>, scalar_prefetch = 0 : i64, scratch_operands = 0 : i64, tpu.core_type = #tpu.core_type<tc>, window_params = [{transform_indices = @transform_0, window_bounds = array<i64: 8, 32>}, {pipeline_mode = #tpu.pipeline_mode<synchronous>, transform_indices = @transform_1, window_bounds = array<i64: 32, 256>}, {pipeline_mode = #tpu.pipeline_mode<synchronous>, transform_indices = @transform_2, window_bounds = array<i64: 1, 256>}, {pipeline_mode = #tpu.pipeline_mode<synchronous>, transform_indices = @transform_3, window_bounds = array<i64: 256, 128>}, {pipeline_mode = #tpu.pipeline_mode<synchronous>, transform_indices = @transform_4, window_bounds = array<i64: 1, 128>}, {pipeline_mode = #tpu.pipeline_mode<synchronous>, transform_indices = @transform_5, window_bounds = array<i64: 128, 128>}, {pipeline_mode = #tpu.pipeline_mode<synchronous>, transform_indices = @transform_6, window_bounds = array<i64: 1, 128>}, {transform_indices = @transform_7, window_bounds = array<i64: 8, 128>}]} {
    %c0 = arith.constant 0 : index
    %c0_0 = arith.constant 0 : index
    %0 = vector.load %arg1[%c0, %c0_0] : memref<8x32xf32, #tpu.memory_space<vmem>>, vector<8x32xf32>
    %1 = arith.truncf %0 : vector<8x32xf32> to vector<8x32xbf16>
    %c0_1 = arith.constant 0 : index
    %c0_2 = arith.constant 0 : index
    %2 = vector.load %arg2[%c0_1, %c0_2] : memref<32x256xbf16, #tpu.memory_space<vmem>>, vector<32x256xbf16>
    %cst = arith.constant dense<0.000000e+00> : vector<8x256xf32>
    %3 = tpu.matmul %1, %2, %cst {dimension_numbers = #tpu.dot_dimension_numbers<[1], [0], [0], [1], [0, 0, 1, 1], [], []>} : vector<8x32xbf16>, vector<32x256xbf16>, vector<8x256xf32> -> vector<8x256xf32>
    %c0_3 = arith.constant 0 : index
    %c0_4 = arith.constant 0 : index
    %4 = vector.load %arg3[%c0_3, %c0_4] : memref<1x256xf32, #tpu.memory_space<vmem>>, vector<1x256xf32>
    %5 = vector.broadcast %4 : vector<1x256xf32> to vector<8x256xf32>
    %6 = arith.addf %3, %5 : vector<8x256xf32>
    %cst_5 = arith.constant 0.000000e+00 : f32
    %7 = vector.broadcast %cst_5 : f32 to vector<8x256xf32>
    %8 = arith.maximumf %6, %7 : vector<8x256xf32>
    %9 = arith.truncf %8 : vector<8x256xf32> to vector<8x256xbf16>
    %c0_6 = arith.constant 0 : index
    %c0_7 = arith.constant 0 : index
    %10 = vector.load %arg4[%c0_6, %c0_7] : memref<256x128xbf16, #tpu.memory_space<vmem>>, vector<256x128xbf16>
    %cst_8 = arith.constant dense<0.000000e+00> : vector<8x128xf32>
    %11 = tpu.matmul %9, %10, %cst_8 {dimension_numbers = #tpu.dot_dimension_numbers<[1], [0], [0], [1], [0, 0, 1, 1], [], []>} : vector<8x256xbf16>, vector<256x128xbf16>, vector<8x128xf32> -> vector<8x128xf32>
    %c0_9 = arith.constant 0 : index
    %c0_10 = arith.constant 0 : index
    %12 = vector.load %arg5[%c0_9, %c0_10] : memref<1x128xf32, #tpu.memory_space<vmem>>, vector<1x128xf32>
    %13 = vector.broadcast %12 : vector<1x128xf32> to vector<8x128xf32>
    %14 = arith.addf %11, %13 : vector<8x128xf32>
    %cst_11 = arith.constant 0.000000e+00 : f32
    %15 = vector.broadcast %cst_11 : f32 to vector<8x128xf32>
    %16 = arith.maximumf %14, %15 : vector<8x128xf32>
    %17 = arith.truncf %16 : vector<8x128xf32> to vector<8x128xbf16>
    %c0_12 = arith.constant 0 : index
    %c0_13 = arith.constant 0 : index
    %18 = vector.load %arg6[%c0_12, %c0_13] : memref<128x128xbf16, #tpu.memory_space<vmem>>, vector<128x128xbf16>
    %cst_14 = arith.constant dense<0.000000e+00> : vector<8x128xf32>
    %19 = tpu.matmul %17, %18, %cst_14 {dimension_numbers = #tpu.dot_dimension_numbers<[1], [0], [0], [1], [0, 0, 1, 1], [], []>} : vector<8x128xbf16>, vector<128x128xbf16>, vector<8x128xf32> -> vector<8x128xf32>
    %c0_15 = arith.constant 0 : index
    %c0_16 = arith.constant 0 : index
    %20 = vector.load %arg7[%c0_15, %c0_16] : memref<1x128xf32, #tpu.memory_space<vmem>>, vector<1x128xf32>
    %21 = vector.broadcast %20 : vector<1x128xf32> to vector<8x128xf32>
    %22 = arith.addf %19, %21 : vector<8x128xf32>
    %23 = arith.negf %22 : vector<8x128xf32>
    %24 = math.exp %23 : vector<8x128xf32>
    %cst_17 = arith.constant 1.000000e+00 : f32
    %25 = vector.broadcast %cst_17 : f32 to vector<8x128xf32>
    %26 = arith.addf %25, %24 : vector<8x128xf32>
    %27 = arith.divf %25, %26 : vector<8x128xf32>
    %28 = arith.truncf %27 : vector<8x128xf32> to vector<8x128xbf16>
    %c0_18 = arith.constant 0 : index
    %c0_19 = arith.constant 0 : index
    %29 = vector.load %arg8[%c0_18, %c0_19] : memref<8x128xbf16, #tpu.memory_space<vmem>>, vector<8x128xbf16>
    tpu.vector_store %arg8[%c0_18, %c0_19], %28 {strides = array<i32>} : memref<8x128xbf16, #tpu.memory_space<vmem>>, vector<8x128xbf16>,
    return
  }
  func.func @transform_0(%arg0: i32) -> (i32, i32) {
    %c0_i32 = arith.constant 0 : i32
    %c0_i32_0 = arith.constant 0 : i32
    return %arg0, %c0_i32 : i32, i32
  }
  func.func @transform_1(%arg0: i32) -> (i32, i32) {
    %c0_i32 = arith.constant 0 : i32
    %c0_i32_0 = arith.constant 0 : i32
    %c0_i32_1 = arith.constant 0 : i32
    return %c0_i32, %c0_i32_0 : i32, i32
  }
  func.func @transform_2(%arg0: i32) -> (i32, i32) {
    %c0_i32 = arith.constant 0 : i32
    %c0_i32_0 = arith.constant 0 : i32
    %c0_i32_1 = arith.constant 0 : i32
    return %c0_i32, %c0_i32_0 : i32, i32
  }
  func.func @transform_3(%arg0: i32) -> (i32, i32) {
    %c0_i32 = arith.constant 0 : i32
    %c0_i32_0 = arith.constant 0 : i32
    %c0_i32_1 = arith.constant 0 : i32
    return %c0_i32, %c0_i32_0 : i32, i32
  }
  func.func @transform_4(%arg0: i32) -> (i32, i32) {
    %c0_i32 = arith.constant 0 : i32
    %c0_i32_0 = arith.constant 0 : i32
    %c0_i32_1 = arith.constant 0 : i32
    return %c0_i32, %c0_i32_0 : i32, i32
  }
  func.func @transform_5(%arg0: i32) -> (i32, i32) {
    %c0_i32 = arith.constant 0 : i32
    %c0_i32_0 = arith.constant 0 : i32
    %c0_i32_1 = arith.constant 0 : i32
    return %c0_i32, %c0_i32_0 : i32, i32
  }
  func.func @transform_6(%arg0: i32) -> (i32, i32) {
    %c0_i32 = arith.constant 0 : i32
    %c0_i32_0 = arith.constant 0 : i32
    %c0_i32_1 = arith.constant 0 : i32
    return %c0_i32, %c0_i32_0 : i32, i32
  }
  func.func @transform_7(%arg0: i32) -> (i32, i32) {
    %c0_i32 = arith.constant 0 : i32
    %c0_i32_0 = arith.constant 0 : i32
    return %arg0, %c0_i32 : i32, i32
  }
}

</mosaic_0001>

<bundles_post_ra>
// kernel: policy_network_forward.1
= control target key start
LH: loop header
LB: loop body
LE: loop exit
PB: predicated region body
PF: predicated region fallthrough
CT: control target
= control target key end

     0   :  { %12 = vsyncpa [#allocation3], 0  ;;  %s849_s0 = inlined_call_operand.hbm [shape: f32[8,32], index: 0, kind: input, shape index: {}]   ;;  %s850_s1 = inlined_call_operand.hbm [shape: bf16[32,256], index: 1, kind: input, shape index: {}]   ;;  %s851_s2 = inlined_call_operand.vmem [shape: f32[1,256], index: 2, kind: input, shape index: {}]   ;;  %s852_s3 = inlined_call_operand.hbm [shape: bf16[256,128], index: 3, kind: input, shape index: {}]   ;;  %s853_s4 = inlined_call_operand.vmem [shape: f32[1,128], index: 4, kind: input, shape index: {}]   ;;  %s854_s5 = inlined_call_operand.hbm [shape: bf16[128,128], index: 5, kind: input, shape index: {}]   ;;  %s855_s6 = inlined_call_operand.vmem [shape: f32[1,128], index: 6, kind: input, shape index: {}]   ;;  %s856_s7 = inlined_call_operand.hbm [shape: bf16[8,128], index: 7, kind: output, shape index: {}]  }
   0x1   :  { %13 = vsyncpa [#allocation6], 0 }
   0x2   :  { %14 = vsyncpa [#allocation9], 0 }
   0x3   :  { %15 = vsyncpa [#allocation4], 0  ;;  %s728_s24 = smov [#allocation5]   ;;  %s610_s28 = scalar_lea.hbm %s850_s1, 512 }
   0x4   :  { %s31_s25 = sshll.u32 %s728_s24, 4  ;;  %p611_p0 = scmp.ne.s32.totalorder %s850_s1, %s610_s28  ;;  %s32_s25 = int_to_ptr.vmem [resolvable:$true] %s31_s25 }
   0x5   :  { %p614_p1 = scmp.lt.u32.totalorder %s610_s28, %s850_s1 }
   0x7   :  { %p616_p2 = pnand %p614_p1, %p611_p0 }
   0x9   :  { %619 = shalt.err (!%p616_p2)
}
   0xa   :  { %s620_s10 = scalar_lea.vmem %s32_s25, 512  ;;  %p625_p4 = scmp.lt.s32.totalorder %s32_s25, %s32_s25 }
   0xb   :  { %p621_p3 = scmp.ne.s32.totalorder %s32_s25, %s620_s10  ;;  %p626_p5 = scmp.lt.s32.totalorder %s620_s10, %s620_s10 }
   0xd   :  { %p627_p6 = por %p626_p5, %p625_p4 }
   0xf   :  { %p628_p7 = pnand %p627_p6, %p621_p3 }
  0x11   :  { %631 = shalt.err (!%p628_p7)
}
  0x12   :  { %s729_s11 = smov 128   ;;  %s730_s12 = smov 8  }
  0x13   :  { %37 = dma.hbm_to_vmem [thread:$0]  %s850_s1, 512, %s32_s25, [#allocation6], %s729_s11, %s729_s11, %s730_s12  }
  0x14   :  { %s731_s15 = smov [#allocation2]   ;;  %s732_s17 = smov [#allocation7]  }
  0x15   :  { %s22_s16 = sshll.u32 %s731_s15, 4  ;;  %s45_s18 = sshll.u32 %s732_s17, 4  ;;  %s23_s16 = int_to_ptr.vmem [resolvable:$true] %s22_s16  ;;  %s46_s18 = int_to_ptr.vmem [resolvable:$true] %s45_s18 }
  0x16   :  { %s632_s21 = scalar_lea.hbm %s849_s0, 128 }
  0x17   :  { %p633_p8 = scmp.ne.s32.totalorder %s849_s0, %s632_s21  ;;  %p636_p9 = scmp.lt.u32.totalorder %s632_s21, %s849_s0 }
  0x19   :  { %p638_p10 = pnand %p636_p9, %p633_p8 }
  0x1b   :  { %641 = shalt.err (!%p638_p10)
}
  0x1c   :  { %s642_s1 = scalar_lea.vmem %s23_s16, 128  ;;  %p647_p12 = scmp.lt.s32.totalorder %s23_s16, %s23_s16 }
  0x1d   :  { %p643_p11 = scmp.ne.s32.totalorder %s23_s16, %s642_s1  ;;  %p648_p13 = scmp.lt.s32.totalorder %s642_s1, %s642_s1 }
  0x1f   :  { %p649_p0 = por %p648_p13, %p647_p12 }
  0x21   :  { %p650_p1 = pnand %p649_p0, %p643_p11 }
  0x23   :  { %653 = shalt.err (!%p650_p1)
}
  0x24   :  { %25 = dma.hbm_to_vmem [thread:$0]  %s849_s0, 128, %s23_s16, [#allocation3]  }
  0x25   :  { %s654_s30 = scalar_lea.hbm %s852_s3, 2048 }
  0x26   :  { %p655_p2 = scmp.ne.s32.totalorder %s852_s3, %s654_s30  ;;  %p658_p3 = scmp.lt.u32.totalorder %s654_s30, %s852_s3 }
  0x28   :  { %p660_p4 = pnand %p658_p3, %p655_p2 }
  0x2a   :  { %663 = shalt.err (!%p660_p4)
}
  0x2b   :  { %s664_s12 = scalar_lea.vmem %s46_s18, 2048  ;;  %p669_p6 = scmp.lt.s32.totalorder %s46_s18, %s46_s18 }
  0x2c   :  { %p665_p5 = scmp.ne.s32.totalorder %s46_s18, %s664_s12  ;;  %p670_p7 = scmp.lt.s32.totalorder %s664_s12, %s664_s12 }
  0x2e   :  { %p671_p8 = por %p670_p7, %p669_p6 }
  0x30   :  { %p672_p9 = pnand %p671_p8, %p665_p5 }
  0x32   :  { %675 = shalt.err (!%p672_p9)
}
  0x33   :  { %s733_s0 = smov 64   ;;  %s734_s13 = smov 4  }
  0x34   :  { %51 = dma.hbm_to_vmem [thread:$0]  %s852_s3, 2048, %s46_s18, [#allocation6], %s733_s0, %s733_s0, %s734_s13  }
  0x35   :  { %s735_s16 = smov [#allocation8]   ;;  %s676_s21 = scalar_lea.hbm %s854_s5, 1024 }
  0x36   :  { %s59_s17 = sshll.u32 %s735_s16, 4  ;;  %p677_p10 = scmp.ne.s32.totalorder %s854_s5, %s676_s21  ;;  %s60_s17 = int_to_ptr.vmem [resolvable:$true] %s59_s17 }
  0x37   :  { %p680_p11 = scmp.lt.u32.totalorder %s676_s21, %s854_s5 }
  0x39   :  { %p682_p12 = pnand %p680_p11, %p677_p10 }
  0x3b   :  { %685 = shalt.err (!%p682_p12)
}
  0x3c   :  { %s686_s1 = scalar_lea.vmem %s60_s17, 1024  ;;  %p691_p0 = scmp.lt.s32.totalorder %s60_s17, %s60_s17 }
  0x3d   :  { %p687_p13 = scmp.ne.s32.totalorder %s60_s17, %s686_s1  ;;  %p692_p1 = scmp.lt.s32.totalorder %s686_s1, %s686_s1 }
  0x3f   :  { %p693_p2 = por %p692_p1, %p691_p0 }
  0x41   :  { %p694_p3 = pnand %p693_p2, %p687_p13 }
  0x43   :  { %697 = shalt.err (!%p694_p3)
}
  0x44   :  { %65 = dma.hbm_to_vmem [thread:$0]  %s854_s5, 1024, %s60_s17, [#allocation9], %s733_s0, %s733_s0, %s734_s13  }
  0x45   :  { %720 = dma.done.wait [#allocation3], 128  }
  0x46   :  { %721 = vsyncadd [#allocation3], 4294967168 }
  0x47   :  { %722 = dma.done.wait [#allocation6], 2560  }
  0x48   :  { %723 = vsyncadd [#allocation6], 4294964736 }
  0x49   :  { %724 = dma.done.wait [#allocation9], 1024  }
  0x4a   :  { %725 = vsyncadd [#allocation9], 4294966272  ;;  %v736_v0 = vmov 0   ;;  %v576_v1 = vld [vmem:[#allocation5 + $0x4] ss:$8 sps:$4 sm:$0xff]   ;;  %v81_v5 = vld [vmem:[#allocation2] sm:$0xff]  ;;  %v89_v30 = vlaneseq }
  0x4b   :  { %155 = vmatprep.mubr.bf16.mxu0 %v736_v0  ;;  %v578_v2 = vld [vmem:[#allocation5] ss:$8 sps:$4 sm:$0xff]   ;;  %123 = vmatprep.subr.bf16.mxu0 %v576_v1  ;;  %v579_v3 = vld [vmem:[#allocation5 + $0x14] ss:$8 sps:$4 sm:$0xff]   ;;  %v581_v4 = vld [vmem:[#allocation5 + $0x10] ss:$8 sps:$4 sm:$0xff]   ;;  %v82_v9 = vpack.c.bf16 %v81_v5, %v81_v5 }
  0x4c   :  { %124 = vmatpush1.bf16.msra.mxu0 %v578_v2  ;;  %v582_v6 = vld [vmem:[#allocation7 + $0x40] sm:$0xff]   ;;  %v584_v8 = vld [vmem:[#allocation7 + $0x48] sm:$0xff]   ;;  %vm119_vm0 = vcmask 261120   ;;  %v586_v11 = vld [vmem:[#allocation7 + $0x50] sm:$0xff]   ;;  %v737_v24 = vmov 0.0   ;;  %v90_v31 = vshrl.u32 %v89_v30, 7 }
  0x4d   :  { %125 = vmatprep.subr.bf16.mxu0 %v579_v3  ;;  %v583_v7 = vld [vmem:[#allocation7] sm:$0xff]   ;;  %513 = vmatprep.subr.bf16.mxu1 %v582_v6  ;;  %v585_v10 = vld [vmem:[#allocation7 + $0x8] sm:$0xff]   ;;  %v587_v12 = vld [vmem:[#allocation7 + $0x10] sm:$0xff]   ;;  %vm738_vm1 = vmmov 0  }
  0x4e   :  { %514 = vmatpush3.bf16.msra.mxu1 %v583_v7  ;;  %v588_v13 = vld [vmem:[#allocation7 + $0x58] sm:$0xff]   ;;  %v590_v15 = vld [vmem:[#allocation7 + $0x60] sm:$0xff]   ;;  %v592_v17 = vld [vmem:[#allocation7 + $0x68] sm:$0xff]   ;;  %v91_v32 = vsub.s32 0, %v90_v31  ;;  %v95_v34 = vsub.s32 1, %v90_v31 }
  0x4f   :  { %515 = vmatprep.subr.bf16.mxu1 %v584_v8  ;;  %v589_v14 = vld [vmem:[#allocation7 + $0x18] sm:$0xff]   ;;  %v591_v16 = vld [vmem:[#allocation7 + $0x20] sm:$0xff]   ;;  %v593_v18 = vld [vmem:[#allocation7 + $0x28] sm:$0xff]  }
  0x50   :  { %126 = vmatpush1.bf16.msra.mxu0 %v581_v4  ;;  %v594_v19 = vld [vmem:[#allocation7 + $0x70] sm:$0xff]   ;;  %v596_v21 = vld [vmem:[#allocation7 + $0x78] sm:$0xff]   ;;  %v598_v23 = vld [vmem:[#allocation8] sm:$0xff]  }
  0x51   :  { %v595_v20 = vld [vmem:[#allocation7 + $0x30] sm:$0xff]   ;;  %v597_v22 = vld [vmem:[#allocation7 + $0x38] sm:$0xff]   ;;  %544 = vmatprep.subr.bf16.mxu0 %v737_v24  ;;  %v599_v25 = vld [vmem:[#allocation8 + $0x8] sm:$0xff]  }
  0x52   :  { %516 = vmatpush3.bf16.msra.mxu1 %v585_v10  ;;  %v600_v26 = vld [vmem:[#allocation8 + $0x10] sm:$0xff]   ;;  %v601_v27 = vld [vmem:[#allocation8 + $0x18] sm:$0xff]   ;;  %v602_v28 = vld [vmem:[#allocation8 + $0x20] sm:$0xff]  }
  0x53   :  { %485 = vmatmul.mubr.msk.bf16.vlgmr.msra.gmra.mrb[0].mxu0 %vm119_vm0, %v82_v9  ;;  %517 = vmatprep.subr.bf16.mxu1 %v586_v11  ;;  %v603_v29 = vld [vmem:[#allocation8 + $0x28] sm:$0xff]   ;;  %v87_v33 = vld [vmem:[%s851_s2] sm:$0x3]  ;;  %v604_v47 = vld [vmem:[#allocation8 + $0x30] sm:$0xff]  }
  0x54   :  { %545 = vmatpush3.bf16.msra.mxu0 %v598_v23  ;;  %v92_v35 = vrot.slane %v87_v33, %v91_v32  ;;  %v96_v36 = vrot.slane %v87_v33, %v95_v34  ;;  %v605_v48 = vld [vmem:[#allocation8 + $0x38] sm:$0xff]   ;;  %560 = vmatprep.mubr.msk.bf16.mxu0 %vm738_vm1, %v737_v24 }
  0x55   :  { %546 = vmatprep.subr.bf16.mxu0 %v737_v24  ;;  %v486_v50 = vld [vmem:[%s853_s4] ss:$0 sm:$0xff]  ;;  %s739_s4 = smov [#allocation10]  }
  0x56   :  { %518 = vmatpush3.bf16.msra.mxu1 %v587_v12  ;;  %v503_v58 = vld [vmem:[%s855_s6] ss:$0 sm:$0xff]  ;;  %s470_s30 = sshll.u32 %s739_s4, 4  ;;  %s471_s30 = int_to_ptr.vmem [resolvable:$true] %s470_s30 }
  0x57   :  { %519 = vmatprep.subr.bf16.mxu1 %v588_v13  ;;  %s698_s8 = scalar_lea.vmem %s471_s30, 64  ;;  %p703_p5 = scmp.lt.s32.totalorder %s471_s30, %s471_s30 }
  0x58   :  { %547 = vmatpush3.bf16.msra.mxu0 %v599_v25  ;;  %p699_p4 = scmp.ne.s32.totalorder %s471_s30, %s698_s8  ;;  %p704_p6 = scmp.lt.s32.totalorder %s698_s8, %s698_s8 }
  0x59   :  { %548 = vmatprep.subr.bf16.mxu0 %v737_v24 }
  0x5a   :  { %520 = vmatpush3.bf16.msra.mxu1 %v589_v14  ;;  %p705_p7 = por %p704_p6, %p703_p5 }
  0x5b   :  { %521 = vmatprep.subr.bf16.mxu1 %v590_v15 }
  0x5c   :  { %549 = vmatpush3.bf16.msra.mxu0 %v600_v26  ;;  %p706_p8 = pnand %p705_p7, %p699_p4 }
  0x5d   :  { %550 = vmatprep.subr.bf16.mxu0 %v737_v24 }
  0x5e   :  { %522 = vmatpush3.bf16.msra.mxu1 %v591_v16 }
  0x5f   :  { %523 = vmatprep.subr.bf16.mxu1 %v592_v17 }
  0x60   :  { %551 = vmatpush3.bf16.msra.mxu0 %v601_v27 }
  0x61   :  { %552 = vmatprep.subr.bf16.mxu0 %v737_v24 }
  0x62   :  { %524 = vmatpush3.bf16.msra.mxu1 %v593_v18 }
  0x63   :  { %525 = vmatprep.subr.bf16.mxu1 %v594_v19 }
  0x64   :  { %553 = vmatpush3.bf16.msra.mxu0 %v602_v28 }
  0x65   :  { %554 = vmatprep.subr.bf16.mxu0 %v737_v24 }
  0x66   :  { %526 = vmatpush3.bf16.msra.mxu1 %v595_v20 }
  0x67   :  { %527 = vmatprep.subr.bf16.mxu1 %v596_v21 }
  0x68   :  { %555 = vmatpush3.bf16.msra.mxu0 %v603_v29 }
  0x69   :  { %556 = vmatprep.subr.bf16.mxu0 %v737_v24 }
  0x6a   :  { %528 = vmatpush3.bf16.msra.mxu1 %v597_v22 }
  0x6c   :  { %557 = vmatpush3.bf16.msra.mxu0 %v604_v47 }
  0x6d   :  { %558 = vmatprep.subr.bf16.mxu0 %v737_v24 }
  0x70   :  { %559 = vmatpush3.bf16.msra.mxu0 %v605_v48 }
 0x126   :  { %v157_v37 = vpop.f32.mrb[0].mxu0 }
 0x127   :  { %v158_v38 = vadd.f32 %v157_v37, %v92_v35  ;;  %v159_v39 = vpop.f32.mrb[1].mxu0 }
 0x128   :  { %v160_v40 = vadd.f32 %v159_v39, %v96_v36  ;;  %v161_v41 = vpop.f32.mrb[2].mxu0 }
 0x129   :  { %v164_v42 = vmax.f32 %v158_v38, 0.0  ;;  %v162_v43 = vpop.f32.mrb[3].mxu0 }
 0x12a   :  { %v165_v44 = vmax.f32 %v160_v40, 0.0 }
 0x12b   :  { %v166_v46 = vpack.c.bf16 %v164_v42, %v164_v42 }
 0x12c   :  { %v167_v45 = vpack.c.bf16 %v165_v44, %v165_v44 }
 0x12e   :  { %335 = vmatprep.mubr.bf16.mxu1 %v167_v45 }
 0x12f   :  { %336 = vmatmul.mubr.bf16.vlgmr.msra.gmra.mrb[0].mxu1 %v166_v46 }
 0x202   :  { %v529_v49 = vpop.f32.mrb[0].mxu1 }
 0x203   :  { %v530_v51 = vpop.f32.mrb[1].mxu1 }
 0x204   :  { %v531_v52 = vadd.f32 %v530_v51, %v529_v49  ;;  %v532_v53 = vpop.f32.mrb[2].mxu1 }
 0x205   :  { %v533_v54 = vpop.f32.mrb[3].mxu1 }
 0x206   :  { %v338_v55 = vadd.f32 %v531_v52, %v486_v50 }
 0x208   :  { %v343_v56 = vmax.f32 %v338_v55, 0.0 }
 0x20a   :  { %v344_v57 = vpack.c.bf16 %v343_v56, %v343_v56 }
 0x20c   :  { %561 = vmatmul.mubr.bf16.vlgmr.msra.gmra.mrb[4].mxu0 %v344_v57 }
 0x2df   :  { %v450_v59 = vpop.f32.mrb[4].mxu0 }
 0x2e0   :  { %v451_v60 = vadd.f32 %v503_v58, %v450_v59  ;;  %v562_v61 = vpop.f32.mrb[5].mxu0 }
 0x2e1   :  { %v453_v62 = vpop.f32.mrb[6].mxu0 }
 0x2e2   :  { %v512_v63 = vmul.f32 -1.442695, %v451_v60  ;;  %v563_v0 = vpop.f32.mrb[7].mxu0 }
 0x2e4   :  { %606 = vpow2.f32 %v512_v63 }
 0x2ee   :  { %v607_v1 = vpop.eup %606 }
 0x2ef   :  { %v459_v2 = vadd.f32 1.0, %v607_v1 }
 0x2f1   :  { %608 = vrcp.f32 %v459_v2 }
 0x2fb   :  { %v609_v3 = vpop.eup %608 }
 0x2fc   :  { %v462_v4 = vpack.c.bf16 %v609_v3, %v609_v3 }
 0x2fe   :  { %463 = vst [vmem:[#allocation10] sm:$0xf] %v462_v4 }
 0x2ff   :  { %709 = shalt.err (!%p706_p8)
}
 0x300   :  { %s710_s10 = scalar_lea.hbm %s856_s7, 64 }
 0x301   :  { %p711_p9 = scmp.ne.s32.totalorder %s856_s7, %s710_s10  ;;  %p714_p10 = scmp.lt.u32.totalorder %s710_s10, %s856_s7 }
 0x303   :  { %p716_p11 = pnand %p714_p10, %p711_p9 }
 0x305   :  { %719 = shalt.err (!%p716_p11)
}
 0x306   :  { %473 = dma.vmem_to_hbm [thread:$0]  %s471_s30, 64, %s856_s7, [#allocation4]  }
 0x307   :  { %726 = dma.done.wait [#allocation4], 64  }
 0x308   :  { %727 = vsyncadd [#allocation4], 4294967232 }
 0x309   :  { %477 = vsyncpa [#allocation3], 1 }
 0x30a   :  { %478 = vsyncpa [#allocation6], 1 }
 0x30b   :  { %479 = vsyncpa [#allocation9], 1 }
 0x30c   :  { %480 = vsyncpa [#allocation4], 1 }

</bundles_post_ra>
